<compile_context>
chip_gen: v5e
topology: v5e:2x2
jax: 0.10.0
libtpu: 0.0.40
codegen_flags: <defaults>
</compile_context>

<pallas_src>
import functools

import jax
import jax.numpy as jnp
from jax import lax
from jax.experimental import pallas as pl
from jax.experimental.pallas import tpu as pltpu


def _round_up(x, m):
    return ((x + m - 1) // m) * m


# --------------------------------------------------------------------------- #
# Kernel
# --------------------------------------------------------------------------- #
def _structure_transition_kernel(
    w1_ref, b1_ref, w2_ref, b2_ref, w3_ref, b3_ref, gamma_ref, beta_ref,
    s_ref, o_ref, *, num_layers, eps,
):
    """One row tile: [TM, C] -> num_layers x (Linear-ReLU-Linear-ReLU-Linear
    + residual) -> LayerNorm.

    Weight layout (y = x @ W + b, i.e. transposed torch Linear.weight):
      w1: [L, C,  CP]   b1: [L, 1, CP]
      w2: [L, CP, CP]   b2: [L, 1, CP]
      w3: [L, CP, C ]   b3: [L, 1, C ]
    CP = round_up(C, 128); padded rows/cols are zero so the math is exact.
    """
    s = s_ref[...].astype(jnp.float32)          # [TM, C] f32 residual stream
    mm_dtype = w1_ref.dtype                     # MXU input dtype (bf16 or f32)

    def layer(l, s):
        # Per-layer weight/bias loads hoisted; blocks are VMEM-resident.
        w1, w2, w3 = w1_ref[l], w2_ref[l], w3_ref[l]
        b1, b2, b3 = b1_ref[l], b2_ref[l], b3_ref[l]
        # Narrow MXU inputs, f32 accumulation; bias / ReLU / residual in f32.
        h = jnp.dot(s.astype(mm_dtype), w1,
                    preferred_element_type=jnp.float32) + b1
        h = jnp.maximum(h, 0.0)
        h = jnp.dot(h.astype(mm_dtype), w2,
                    preferred_element_type=jnp.float32) + b2
        h = jnp.maximum(h, 0.0)
        h = jnp.dot(h.astype(mm_dtype), w3,
                    preferred_element_type=jnp.float32) + b3
        return s + h                            # residual add

    if num_layers <= 4:
        # Static unroll: full scheduler visibility for small layer counts.
        for l in range(num_layers):
            s = layer(l, s)
    else:
        # Deeper stacks: bound vreg live ranges with a real loop.
        s = lax.fori_loop(0, num_layers, layer, s, unroll=2)

    # TODO(synk): nn.Dropout is identity at inference; the training-mode mask
    # (pltpu.prng_random_bits) is not emitted here.

    # LayerNorm over the channel axis: centered two-pass variance in f32.
    inv_c = jnp.float32(1.0 / s.shape[-1])
    mean = jnp.sum(s, axis=-1, keepdims=True) * inv_c
    d = s - mean
    var = jnp.sum(d * d, axis=-1, keepdims=True) * inv_c
    out = d * lax.rsqrt(var + eps) * gamma_ref[...] + beta_ref[...]
    o_ref[...] = out.astype(o_ref.dtype)


# --------------------------------------------------------------------------- #
# One-time parameter preparation (call at init, NOT per forward)
# --------------------------------------------------------------------------- #
def prepare_params(params, *, weight_dtype=jnp.bfloat16):
    """Pad the hidden MLP width to CP = round_up(C, 128) with zeros (exact) and
    cast the matmul weights to `weight_dtype` (bf16 MXU inputs by default;
    pass jnp.float32 for an exact path)."""
    c = params["w1"].shape[-1]
    cp = max(_round_up(c, 128), 128)
    pc = cp - c
    f32 = jnp.float32
    return {
        "c": c,
        "cp": cp,
        "w1": jnp.pad(params["w1"], ((0, 0), (0, 0), (0, pc))).astype(weight_dtype),
        "w2": jnp.pad(params["w2"], ((0, 0), (0, pc), (0, pc))).astype(weight_dtype),
        "w3": jnp.pad(params["w3"], ((0, 0), (0, pc), (0, 0))).astype(weight_dtype),
        "b1": jnp.pad(params["b1"], ((0, 0), (0, 0), (0, pc))).astype(f32),
        "b2": jnp.pad(params["b2"], ((0, 0), (0, 0), (0, pc))).astype(f32),
        "b3": params["b3"].astype(f32),
        "gamma": params["gamma"].astype(f32),
        "beta": params["beta"].astype(f32),
    }


def _vmem_limit_bytes(tm, c, cp, num_layers, in_itemsize, out_itemsize, w_itemsize):
    # The default pipeline keeps 2 buffers per operand (constant-index weight
    # blocks are DMA'd once but still occupy two buffers).
    weights = 2 * num_layers * (2 * c * cp + cp * cp) * w_itemsize
    biases = 2 * (num_layers * (2 * cp + c) + 2 * c) * 4
    acts = 2 * tm * c * (in_itemsize + out_itemsize)
    scratch = 8 * tm * cp * 4              # f32 temporaries + headroom
    need = weights + biases + acts + scratch
    # Cap well below v7x's 64 MiB physical VMEM; floor above v5e's 16 MiB
    # scoped default so weight residency is never throttled.
    return int(min(48 * 1024 * 1024, max(2 * need, 16 * 1024 * 1024)))


# --------------------------------------------------------------------------- #
# Forward wrapper
# --------------------------------------------------------------------------- #
def structure_transition(s, prepped, *, eps=1e-5, tm=1024):
    """StructureTransition forward. `prepped` is the output of prepare_params().

    s: [..., C] in the model dtype (f32 or bf16); the output matches s.dtype.
    """
    orig_shape = s.shape
    c = orig_shape[-1]
    assert c == prepped["c"], "params were prepared for a different channel dim"
    cp = prepped["cp"]
    num_layers = prepped["w1"].shape[0]

    s2d = s.reshape(-1, c)                  # keep caller dtype; no pad / cast
    n = s2d.shape[0]

    # Row tile: large (amortize ~0.35us per grid step), but balanced so the
    # grid has >= 2 steps whenever N > tm (megacore sharding on v7x).
    if n <= tm:
        tm_eff = n                          # single block == full row extent
    else:
        n_tiles = pl.cdiv(n, tm)
        tm_eff = _round_up(pl.cdiv(n, n_tiles), 8)
    grid = (pl.cdiv(n, tm_eff),)            # ragged last block handled by Pallas

    kernel = functools.partial(
        _structure_transition_kernel, num_layers=num_layers, eps=eps)

    # Constant index maps -> weights/biases DMA'd once, resident across grid.
    full = lambda a: pl.BlockSpec(a.shape, lambda i: (0,) * a.ndim)

    out = pl.pallas_call(
        kernel,
        out_shape=jax.ShapeDtypeStruct((n, c), s.dtype),
        grid_spec=pltpu.PrefetchScalarGridSpec(
            num_scalar_prefetch=0,
            grid=grid,
            in_specs=[
                full(prepped["w1"]), full(prepped["b1"]),
                full(prepped["w2"]), full(prepped["b2"]),
                full(prepped["w3"]), full(prepped["b3"]),
                full(prepped["gamma"]), full(prepped["beta"]),
                pl.BlockSpec((tm_eff, c), lambda i: (i, 0)),
            ],
            out_specs=pl.BlockSpec((tm_eff, c), lambda i: (i, 0)),
        ),
        compiler_params=pltpu.CompilerParams(
            dimension_semantics=("parallel",),
            vmem_limit_bytes=_vmem_limit_bytes(
                tm_eff, c, cp, num_layers,
                s.dtype.itemsize, s.dtype.itemsize,
                prepped["w1"].dtype.itemsize),
        ),
    )(prepped["w1"], prepped["b1"], prepped["w2"], prepped["b2"],
      prepped["w3"], prepped["b3"], prepped["gamma"], prepped["beta"], s2d)

    return out.reshape(orig_shape)


# --------------------------------------------------------------------------- #
# Test scaffolding
# --------------------------------------------------------------------------- #
def make_params(key, c, num_layers):
    """Deterministic synthetic init matching the module's parameter shapes.

    torch: linear_1/2 use 'relu' (He) init, linear_3 uses 'final' (zeros) init.
    We keep He scaling for w1/w2 but use small random w3 / nonzero b1,b2 so the
    residual and bias paths are actually exercised in testing.
    """
    ks = jax.random.split(key, 5 * num_layers)
    he = (2.0 / c) ** 0.5
    w1 = jnp.stack([jax.random.normal(ks[5 * l + 0], (c, c), jnp.float32) * he
                    for l in range(num_layers)])
    w2 = jnp.stack([jax.random.normal(ks[5 * l + 1], (c, c), jnp.float32) * he
                    for l in range(num_layers)])
    w3 = jnp.stack([jax.random.normal(ks[5 * l + 2], (c, c), jnp.float32) * 0.02
                    for l in range(num_layers)])
    b1 = jnp.stack([jax.random.normal(ks[5 * l + 3], (1, c), jnp.float32) * 0.1
                    for l in range(num_layers)])
    b2 = jnp.stack([jax.random.normal(ks[5 * l + 4], (1, c), jnp.float32) * 0.1
                    for l in range(num_layers)])
    b3 = jnp.zeros((num_layers, 1, c), jnp.float32)
    return {
        "w1": w1, "b1": b1,
        "w2": w2, "b2": b2,
        "w3": w3, "b3": b3,
        "gamma": jnp.ones((1, c), jnp.float32),
        "beta": jnp.zeros((1, c), jnp.float32),
    }


def reference(s, params, eps=1e-5):
    """Pure-JAX f32 reference mirroring the PyTorch forward (eval mode)."""
    num_layers = params["w1"].shape[0]
    for l in range(num_layers):
        s0 = s
        h = jax.nn.relu(s @ params["w1"][l] + params["b1"][l][0])
        h = jax.nn.relu(h @ params["w2"][l] + params["b2"][l][0])
        h = h @ params["w3"][l] + params["b3"][l][0]
        s = s0 + h
    mean = s.mean(-1, keepdims=True)
    var = ((s - mean) ** 2).mean(-1, keepdims=True)
    return (s - mean) / jnp.sqrt(var + eps) * params["gamma"][0] + params["beta"][0]


if __name__ == "__main__":
    C = 32
    NUM_LAYERS = 2
    BATCH, SEQ = 2, 8

    key = jax.random.PRNGKey(0)
    k_s, k_p = jax.random.split(key)
    s = jax.random.normal(k_s, (BATCH, SEQ, C), jnp.float32)
    params = make_params(k_p, C, NUM_LAYERS)

    # One-time parameter prep (hoisted out of the forward path).
    prepped = prepare_params(params)           # bf16 MXU inputs (default)

    out = structure_transition(s, prepped)
    out = jax.block_until_ready(out)
    assert out.shape == s.shape and out.dtype == s.dtype

    ref = reference(s.reshape(-1, C), params).reshape(s.shape)
    # Relaxed tolerance: matmul inputs are bf16 (f32 accumulation, f32 LN).
    # Use prepare_params(params, weight_dtype=jnp.float32) for an exact path.
    assert jnp.allclose(out, ref, atol=5e-2, rtol=5e-2), "mismatch vs reference"

    print("KERNEL_OK")
</pallas_src>

<mosaic_0001>
module attributes {stable_mosaic.version = 11 : i64} {
  func.func @_structure_transition_kernel(%arg0: i32, %arg1: memref<2x32x128xbf16, #tpu.memory_space<vmem>>, %arg2: memref<2x1x128xf32, #tpu.memory_space<vmem>>, %arg3: memref<2x128x128xbf16, #tpu.memory_space<vmem>>, %arg4: memref<2x1x128xf32, #tpu.memory_space<vmem>>, %arg5: memref<2x128x32xbf16, #tpu.memory_space<vmem>>, %arg6: memref<2x1x32xf32, #tpu.memory_space<vmem>>, %arg7: memref<1x32xf32, #tpu.memory_space<vmem>>, %arg8: memref<1x32xf32, #tpu.memory_space<vmem>>, %arg9: memref<16x32xf32, #tpu.memory_space<vmem>>, %arg10: memref<16x32xf32, #tpu.memory_space<vmem>>) attributes {dimension_semantics = [#tpu.dimension_semantics<parallel>], iteration_bounds = array<i64: 1>, scalar_prefetch = 0 : i64, scratch_operands = 0 : i64, tpu.core_type = #tpu.core_type<tc>, window_params = [{pipeline_mode = #tpu.pipeline_mode<synchronous>, transform_indices = @transform_0, window_bounds = array<i64: 2, 32, 128>}, {pipeline_mode = #tpu.pipeline_mode<synchronous>, transform_indices = @transform_1, window_bounds = array<i64: 2, 1, 128>}, {pipeline_mode = #tpu.pipeline_mode<synchronous>, transform_indices = @transform_2, window_bounds = array<i64: 2, 128, 128>}, {pipeline_mode = #tpu.pipeline_mode<synchronous>, transform_indices = @transform_3, window_bounds = array<i64: 2, 1, 128>}, {pipeline_mode = #tpu.pipeline_mode<synchronous>, transform_indices = @transform_4, window_bounds = array<i64: 2, 128, 32>}, {pipeline_mode = #tpu.pipeline_mode<synchronous>, transform_indices = @transform_5, window_bounds = array<i64: 2, 1, 32>}, {pipeline_mode = #tpu.pipeline_mode<synchronous>, transform_indices = @transform_6, window_bounds = array<i64: 1, 32>}, {pipeline_mode = #tpu.pipeline_mode<synchronous>, transform_indices = @transform_7, window_bounds = array<i64: 1, 32>}, {transform_indices = @transform_8, window_bounds = array<i64: 16, 32>}, {transform_indices = @transform_9, window_bounds = array<i64: 16, 32>}]} {
    %c0 = arith.constant 0 : index
    %c0_0 = arith.constant 0 : index
    %0 = vector.load %arg9[%c0, %c0_0] : memref<16x32xf32, #tpu.memory_space<vmem>>, vector<16x32xf32>
    %c0_1 = arith.constant 0 : index
    %c0_2 = arith.constant 0 : index
    %c0_3 = arith.constant 0 : index
    %1 = vector.load %arg1[%c0_1, %c0_2, %c0_3] : memref<2x32x128xbf16, #tpu.memory_space<vmem>>, vector<1x32x128xbf16>
    %2 = vector.shape_cast %1 : vector<1x32x128xbf16> to vector<32x128xbf16>
    %c0_4 = arith.constant 0 : index
    %c0_5 = arith.constant 0 : index
    %c0_6 = arith.constant 0 : index
    %3 = vector.load %arg3[%c0_4, %c0_5, %c0_6] : memref<2x128x128xbf16, #tpu.memory_space<vmem>>, vector<1x128x128xbf16>
    %4 = vector.shape_cast %3 : vector<1x128x128xbf16> to vector<128x128xbf16>
    %c0_7 = arith.constant 0 : index
    %c0_8 = arith.constant 0 : index
    %c0_9 = arith.constant 0 : index
    %5 = vector.load %arg5[%c0_7, %c0_8, %c0_9] : memref<2x128x32xbf16, #tpu.memory_space<vmem>>, vector<1x128x32xbf16>
    %6 = vector.shape_cast %5 : vector<1x128x32xbf16> to vector<128x32xbf16>
    %c0_10 = arith.constant 0 : index
    %c0_11 = arith.constant 0 : index
    %c0_12 = arith.constant 0 : index
    %7 = vector.load %arg2[%c0_10, %c0_11, %c0_12] : memref<2x1x128xf32, #tpu.memory_space<vmem>>, vector<1x1x128xf32>
    %8 = vector.shape_cast %7 : vector<1x1x128xf32> to vector<1x128xf32>
    %c0_13 = arith.constant 0 : index
    %c0_14 = arith.constant 0 : index
    %c0_15 = arith.constant 0 : index
    %9 = vector.load %arg4[%c0_13, %c0_14, %c0_15] : memref<2x1x128xf32, #tpu.memory_space<vmem>>, vector<1x1x128xf32>
    %10 = vector.shape_cast %9 : vector<1x1x128xf32> to vector<1x128xf32>
    %c0_16 = arith.constant 0 : index
    %c0_17 = arith.constant 0 : index
    %c0_18 = arith.constant 0 : index
    %11 = vector.load %arg6[%c0_16, %c0_17, %c0_18] : memref<2x1x32xf32, #tpu.memory_space<vmem>>, vector<1x1x32xf32>
    %12 = vector.shape_cast %11 : vector<1x1x32xf32> to vector<1x32xf32>
    %13 = arith.truncf %0 : vector<16x32xf32> to vector<16x32xbf16>
    %cst = arith.constant dense<0.000000e+00> : vector<16x128xf32>
    %14 = tpu.matmul %13, %2, %cst {dimension_numbers = #tpu.dot_dimension_numbers<[1], [0], [0], [1], [0, 0, 1, 1], [], []>} : vector<16x32xbf16>, vector<32x128xbf16>, vector<16x128xf32> -> vector<16x128xf32>
    %15 = vector.broadcast %8 : vector<1x128xf32> to vector<16x128xf32>
    %16 = arith.addf %14, %15 : vector<16x128xf32>
    %cst_19 = arith.constant 0.000000e+00 : f32
    %17 = vector.broadcast %cst_19 : f32 to vector<16x128xf32>
    %18 = arith.maximumf %16, %17 : vector<16x128xf32>
    %19 = arith.truncf %18 : vector<16x128xf32> to vector<16x128xbf16>
    %cst_20 = arith.constant dense<0.000000e+00> : vector<16x128xf32>
    %20 = tpu.matmul %19, %4, %cst_20 {dimension_numbers = #tpu.dot_dimension_numbers<[1], [0], [0], [1], [0, 0, 1, 1], [], []>} : vector<16x128xbf16>, vector<128x128xbf16>, vector<16x128xf32> -> vector<16x128xf32>
    %21 = vector.broadcast %10 : vector<1x128xf32> to vector<16x128xf32>
    %22 = arith.addf %20, %21 : vector<16x128xf32>
    %cst_21 = arith.constant 0.000000e+00 : f32
    %23 = vector.broadcast %cst_21 : f32 to vector<16x128xf32>
    %24 = arith.maximumf %22, %23 : vector<16x128xf32>
    %25 = arith.truncf %24 : vector<16x128xf32> to vector<16x128xbf16>
    %cst_22 = arith.constant dense<0.000000e+00> : vector<16x32xf32>
    %26 = tpu.matmul %25, %6, %cst_22 {dimension_numbers = #tpu.dot_dimension_numbers<[1], [0], [0], [1], [0, 0, 1, 1], [], []>} : vector<16x128xbf16>, vector<128x32xbf16>, vector<16x32xf32> -> vector<16x32xf32>
    %27 = vector.broadcast %12 : vector<1x32xf32> to vector<16x32xf32>
    %28 = arith.addf %26, %27 : vector<16x32xf32>
    %29 = arith.addf %0, %28 : vector<16x32xf32>
    %c1 = arith.constant 1 : index
    %c0_23 = arith.constant 0 : index
    %c0_24 = arith.constant 0 : index
    %30 = vector.load %arg1[%c1, %c0_23, %c0_24] : memref<2x32x128xbf16, #tpu.memory_space<vmem>>, vector<1x32x128xbf16>
    %31 = vector.shape_cast %30 : vector<1x32x128xbf16> to vector<32x128xbf16>
    %c1_25 = arith.constant 1 : index
    %c0_26 = arith.constant 0 : index
    %c0_27 = arith.constant 0 : index
    %32 = vector.load %arg3[%c1_25, %c0_26, %c0_27] : memref<2x128x128xbf16, #tpu.memory_space<vmem>>, vector<1x128x128xbf16>
    %33 = vector.shape_cast %32 : vector<1x128x128xbf16> to vector<128x128xbf16>
    %c1_28 = arith.constant 1 : index
    %c0_29 = arith.constant 0 : index
    %c0_30 = arith.constant 0 : index
    %34 = vector.load %arg5[%c1_28, %c0_29, %c0_30] : memref<2x128x32xbf16, #tpu.memory_space<vmem>>, vector<1x128x32xbf16>
    %35 = vector.shape_cast %34 : vector<1x128x32xbf16> to vector<128x32xbf16>
    %c1_31 = arith.constant 1 : index
    %c0_32 = arith.constant 0 : index
    %c0_33 = arith.constant 0 : index
    %36 = vector.load %arg2[%c1_31, %c0_32, %c0_33] : memref<2x1x128xf32, #tpu.memory_space<vmem>>, vector<1x1x128xf32>
    %37 = vector.shape_cast %36 : vector<1x1x128xf32> to vector<1x128xf32>
    %c1_34 = arith.constant 1 : index
    %c0_35 = arith.constant 0 : index
    %c0_36 = arith.constant 0 : index
    %38 = vector.load %arg4[%c1_34, %c0_35, %c0_36] : memref<2x1x128xf32, #tpu.memory_space<vmem>>, vector<1x1x128xf32>
    %39 = vector.shape_cast %38 : vector<1x1x128xf32> to vector<1x128xf32>
    %c1_37 = arith.constant 1 : index
    %c0_38 = arith.constant 0 : index
    %c0_39 = arith.constant 0 : index
    %40 = vector.load %arg6[%c1_37, %c0_38, %c0_39] : memref<2x1x32xf32, #tpu.memory_space<vmem>>, vector<1x1x32xf32>
    %41 = vector.shape_cast %40 : vector<1x1x32xf32> to vector<1x32xf32>
    %42 = arith.truncf %29 : vector<16x32xf32> to vector<16x32xbf16>
    %cst_40 = arith.constant dense<0.000000e+00> : vector<16x128xf32>
    %43 = tpu.matmul %42, %31, %cst_40 {dimension_numbers = #tpu.dot_dimension_numbers<[1], [0], [0], [1], [0, 0, 1, 1], [], []>} : vector<16x32xbf16>, vector<32x128xbf16>, vector<16x128xf32> -> vector<16x128xf32>
    %44 = vector.broadcast %37 : vector<1x128xf32> to vector<16x128xf32>
    %45 = arith.addf %43, %44 : vector<16x128xf32>
    %cst_41 = arith.constant 0.000000e+00 : f32
    %46 = vector.broadcast %cst_41 : f32 to vector<16x128xf32>
    %47 = arith.maximumf %45, %46 : vector<16x128xf32>
    %48 = arith.truncf %47 : vector<16x128xf32> to vector<16x128xbf16>
    %cst_42 = arith.constant dense<0.000000e+00> : vector<16x128xf32>
    %49 = tpu.matmul %48, %33, %cst_42 {dimension_numbers = #tpu.dot_dimension_numbers<[1], [0], [0], [1], [0, 0, 1, 1], [], []>} : vector<16x128xbf16>, vector<128x128xbf16>, vector<16x128xf32> -> vector<16x128xf32>
    %50 = vector.broadcast %39 : vector<1x128xf32> to vector<16x128xf32>
    %51 = arith.addf %49, %50 : vector<16x128xf32>
    %cst_43 = arith.constant 0.000000e+00 : f32
    %52 = vector.broadcast %cst_43 : f32 to vector<16x128xf32>
    %53 = arith.maximumf %51, %52 : vector<16x128xf32>
    %54 = arith.truncf %53 : vector<16x128xf32> to vector<16x128xbf16>
    %cst_44 = arith.constant dense<0.000000e+00> : vector<16x32xf32>
    %55 = tpu.matmul %54, %35, %cst_44 {dimension_numbers = #tpu.dot_dimension_numbers<[1], [0], [0], [1], [0, 0, 1, 1], [], []>} : vector<16x128xbf16>, vector<128x32xbf16>, vector<16x32xf32> -> vector<16x32xf32>
    %56 = vector.broadcast %41 : vector<1x32xf32> to vector<16x32xf32>
    %57 = arith.addf %55, %56 : vector<16x32xf32>
    %58 = arith.addf %29, %57 : vector<16x32xf32>
    %cst_45 = arith.constant dense<0.000000e+00> : vector<16xf32>
    %59 = vector.multi_reduction <add>, %58, %cst_45 [1] : vector<16x32xf32> to vector<16xf32>
    %60 = vector.shape_cast %59 : vector<16xf32> to vector<16x1xf32>
    %cst_46 = arith.constant 3.125000e-02 : f32
    %61 = vector.broadcast %cst_46 : f32 to vector<16x1xf32>
    %62 = arith.mulf %60, %61 : vector<16x1xf32>
    %63 = vector.broadcast %62 : vector<16x1xf32> to vector<16x32xf32>
    %64 = arith.subf %58, %63 : vector<16x32xf32>
    %65 = arith.mulf %64, %64 : vector<16x32xf32>
    %cst_47 = arith.constant dense<0.000000e+00> : vector<16xf32>
    %66 = vector.multi_reduction <add>, %65, %cst_47 [1] : vector<16x32xf32> to vector<16xf32>
    %67 = vector.shape_cast %66 : vector<16xf32> to vector<16x1xf32>
    %cst_48 = arith.constant 3.125000e-02 : f32
    %68 = vector.broadcast %cst_48 : f32 to vector<16x1xf32>
    %69 = arith.mulf %67, %68 : vector<16x1xf32>
    %cst_49 = arith.constant 9.99999974E-6 : f32
    %70 = vector.broadcast %cst_49 : f32 to vector<16x1xf32>
    %71 = arith.addf %69, %70 : vector<16x1xf32>
    %72 = math.rsqrt %71 : vector<16x1xf32>
    %73 = vector.broadcast %72 : vector<16x1xf32> to vector<16x32xf32>
    %74 = arith.mulf %64, %73 : vector<16x32xf32>
    %c0_50 = arith.constant 0 : index
    %c0_51 = arith.constant 0 : index
    %75 = vector.load %arg7[%c0_50, %c0_51] : memref<1x32xf32, #tpu.memory_space<vmem>>, vector<1x32xf32>
    %76 = vector.broadcast %75 : vector<1x32xf32> to vector<16x32xf32>
    %77 = arith.mulf %74, %76 : vector<16x32xf32>
    %c0_52 = arith.constant 0 : index
    %c0_53 = arith.constant 0 : index
    %78 = vector.load %arg8[%c0_52, %c0_53] : memref<1x32xf32, #tpu.memory_space<vmem>>, vector<1x32xf32>
    %79 = vector.broadcast %78 : vector<1x32xf32> to vector<16x32xf32>
    %80 = arith.addf %77, %79 : vector<16x32xf32>
    %c0_54 = arith.constant 0 : index
    %c0_55 = arith.constant 0 : index
    %81 = vector.load %arg10[%c0_54, %c0_55] : memref<16x32xf32, #tpu.memory_space<vmem>>, vector<16x32xf32>
    tpu.vector_store %arg10[%c0_54, %c0_55], %80 {strides = array<i32>} : memref<16x32xf32, #tpu.memory_space<vmem>>, vector<16x32xf32>,
    return
  }
  func.func @transform_0(%arg0: i32) -> (i32, i32, i32) {
    %c0_i32 = arith.constant 0 : i32
    %c0_i32_0 = arith.constant 0 : i32
    %c0_i32_1 = arith.constant 0 : i32
    %c0_i32_2 = arith.constant 0 : i32
    return %c0_i32, %c0_i32_0, %c0_i32_1 : i32, i32, i32
  }
  func.func @transform_1(%arg0: i32) -> (i32, i32, i32) {
    %c0_i32 = arith.constant 0 : i32
    %c0_i32_0 = arith.constant 0 : i32
    %c0_i32_1 = arith.constant 0 : i32
    %c0_i32_2 = arith.constant 0 : i32
    return %c0_i32, %c0_i32_0, %c0_i32_1 : i32, i32, i32
  }
  func.func @transform_2(%arg0: i32) -> (i32, i32, i32) {
    %c0_i32 = arith.constant 0 : i32
    %c0_i32_0 = arith.constant 0 : i32
    %c0_i32_1 = arith.constant 0 : i32
    %c0_i32_2 = arith.constant 0 : i32
    return %c0_i32, %c0_i32_0, %c0_i32_1 : i32, i32, i32
  }
  func.func @transform_3(%arg0: i32) -> (i32, i32, i32) {
    %c0_i32 = arith.constant 0 : i32
    %c0_i32_0 = arith.constant 0 : i32
    %c0_i32_1 = arith.constant 0 : i32
    %c0_i32_2 = arith.constant 0 : i32
    return %c0_i32, %c0_i32_0, %c0_i32_1 : i32, i32, i32
  }
  func.func @transform_4(%arg0: i32) -> (i32, i32, i32) {
    %c0_i32 = arith.constant 0 : i32
    %c0_i32_0 = arith.constant 0 : i32
    %c0_i32_1 = arith.constant 0 : i32
    %c0_i32_2 = arith.constant 0 : i32
    return %c0_i32, %c0_i32_0, %c0_i32_1 : i32, i32, i32
  }
  func.func @transform_5(%arg0: i32) -> (i32, i32, i32) {
    %c0_i32 = arith.constant 0 : i32
    %c0_i32_0 = arith.constant 0 : i32
    %c0_i32_1 = arith.constant 0 : i32
    %c0_i32_2 = arith.constant 0 : i32
    return %c0_i32, %c0_i32_0, %c0_i32_1 : i32, i32, i32
  }
  func.func @transform_6(%arg0: i32) -> (i32, i32) {
    %c0_i32 = arith.constant 0 : i32
    %c0_i32_0 = arith.constant 0 : i32
    %c0_i32_1 = arith.constant 0 : i32
    return %c0_i32, %c0_i32_0 : i32, i32
  }
  func.func @transform_7(%arg0: i32) -> (i32, i32) {
    %c0_i32 = arith.constant 0 : i32
    %c0_i32_0 = arith.constant 0 : i32
    %c0_i32_1 = arith.constant 0 : i32
    return %c0_i32, %c0_i32_0 : i32, i32
  }
  func.func @transform_8(%arg0: i32) -> (i32, i32) {
    %c0_i32 = arith.constant 0 : i32
    %c0_i32_0 = arith.constant 0 : i32
    return %arg0, %c0_i32 : i32, i32
  }
  func.func @transform_9(%arg0: i32) -> (i32, i32) {
    %c0_i32 = arith.constant 0 : i32
    %c0_i32_0 = arith.constant 0 : i32
    return %arg0, %c0_i32 : i32, i32
  }
}

</mosaic_0001>

<bundles_post_ra>
// kernel: tpu_custom_call.1
= control target key start
LH: loop header
LB: loop body
LE: loop exit
PB: predicated region body
PF: predicated region fallthrough
CT: control target
= control target key end

     0   :  { %14 = vsyncpa [#allocation3], 0  ;;  %s1141_s0 = inlined_call_operand.vmem [shape: bf16[2,32,128], index: 0, kind: input, shape index: {}]   ;;  %s1142_s1 = inlined_call_operand.hbm [shape: f32[2,1,128], index: 1, kind: input, shape index: {}]   ;;  %s1143_s2 = inlined_call_operand.vmem [shape: bf16[2,128,128], index: 2, kind: input, shape index: {}]   ;;  %s1144_s3 = inlined_call_operand.hbm [shape: f32[2,1,128], index: 3, kind: input, shape index: {}]   ;;  %s1145_s4 = inlined_call_operand.vmem [shape: bf16[2,128,32], index: 4, kind: input, shape index: {}]   ;;  %s1146_s5 = inlined_call_operand.vmem [shape: f32[2,1,32], index: 5, kind: input, shape index: {}]   ;;  %s1147_s6 = inlined_call_operand.vmem [shape: f32[1,32], index: 6, kind: input, shape index: {}]   ;;  %s1148_s7 = inlined_call_operand.vmem [shape: f32[1,32], index: 7, kind: input, shape index: {}]   ;;  %s1149_s8 = inlined_call_operand.hbm [shape: f32[16,32], index: 8, kind: input, shape index: {}]   ;;  %s1150_s9 = inlined_call_operand.hbm [shape: f32[16,32], index: 9, kind: output, shape index: {}]  }
   0x1   :  { %15 = vsyncpa [#allocation6], 0 }
   0x2   :  { %16 = vsyncpa [#allocation4], 0  ;;  %s38_s11 = sshll.u32 %s1144_s3, 4  ;;  %s929_s12 = smov [#allocation5]   ;;  %s39_s11 = int_to_ptr.hbm [resolvable:$true] %s38_s11 }
   0x3   :  { %s40_s13 = sshll.u32 %s929_s12, 4  ;;  %s23_s16 = sshll.u32 %s1142_s1, 4  ;;  %s41_s13 = int_to_ptr.vmem [resolvable:$true] %s40_s13  ;;  %s24_s16 = int_to_ptr.hbm [resolvable:$true] %s23_s16 }
   0x4   :  { %s930_s17 = smov 16   ;;  %s931_s18 = smov 1  }
   0x5   :  { %46 = dma.hbm_to_vmem [thread:$0]  %s39_s11, 32, %s41_s13, [#allocation6], %s930_s17, %s930_s17, %s931_s18  }
   0x6   :  { %s932_s19 = smov [#allocation2]   ;;  %s59_s23 = sshll.u32 %s1149_s8, 4  ;;  %s60_s23 = int_to_ptr.hbm [resolvable:$true] %s59_s23 }
   0x7   :  { %s25_s20 = sshll.u32 %s932_s19, 4  ;;  %s933_s3 = smov [#allocation7]   ;;  %s26_s20 = int_to_ptr.vmem [resolvable:$true] %s25_s20 }
   0x8   :  { %31 = dma.hbm_to_vmem [thread:$0]  %s24_s16, 32, %s26_s20, [#allocation3], %s930_s17, %s930_s17, %s931_s18  }
   0x9   :  { %s61_s24 = sshll.u32 %s933_s3, 4  ;;  %s934_s25 = smov 128   ;;  %s62_s24 = int_to_ptr.vmem [resolvable:$true] %s61_s24 }
   0xa   :  { %s935_s26 = smov 8  }
   0xb   :  { %67 = dma.hbm_to_vmem [thread:$0]  %s60_s23, 256, %s62_s24, [#allocation6], %s934_s25, %s934_s25, %s935_s26  }
   0xc   :  { %923 = dma.done.wait [#allocation3], 32  }
   0xd   :  { %924 = vsyncadd [#allocation3], 4294967264 }
   0xe   :  { %925 = dma.done.wait [#allocation6], 288  }
   0xf   :  { %926 = vsyncadd [#allocation6], 4294967008  ;;  %v772_v0 = vld [vmem:[%s1141_s0 + $0x8] sm:$0xff]  ;;  %v771_v1 = vld [vmem:[%s1141_s0] sm:$0xff]  ;;  %vm138_vm0 = vcmask 261120   ;;  %s574_s16 = sshll.u32 %s1150_s9, 4  ;;  %s575_s16 = int_to_ptr.hbm [resolvable:$true] %s574_s16 }
  0x10   :  { %v780_v2 = vld [vmem:[%s1143_s2 + $0x38] sm:$0xff]  ;;  %148 = vmatpush.bf16.msra.mxu0 %v772_v0  ;;  %v1008_v3 = vld [vmem:[#allocation7] sm:$0xff]  ;;  %v1010_v4 = vld [vmem:[#allocation7 + $0x8] sm:$0xff] }
  0x11   :  { %210 = vmatpush.bf16.msra.mxu1 %v780_v2  ;;  %v779_v5 = vld [vmem:[%s1143_s2 + $0x30] sm:$0xff]  ;;  %v122_v6 = vpack.c.bf16 %v1010_v4, %v1008_v3  ;;  %v778_v7 = vld [vmem:[%s1143_s2 + $0x28] sm:$0xff]  ;;  %v777_v8 = vld [vmem:[%s1143_s2 + $0x20] sm:$0xff] }
  0x12   :  { %v776_v9 = vld [vmem:[%s1143_s2 + $0x18] sm:$0xff]  ;;  %v775_v10 = vld [vmem:[%s1143_s2 + $0x10] sm:$0xff]  ;;  %v774_v11 = vld [vmem:[%s1143_s2 + $0x8] sm:$0xff] }
  0x13   :  { %v773_v12 = vld [vmem:[%s1143_s2] sm:$0xff]  ;;  %v788_v13 = vld [vmem:[%s1145_s4 + $0x38] sm:$0xff]  ;;  %v787_v14 = vld [vmem:[%s1145_s4 + $0x30] sm:$0xff] }
  0x14   :  { %149 = vmatpush.bf16.msra.mxu0 %v771_v1  ;;  %278 = vmatpush.bf16.msra.mxu2 %v788_v13  ;;  %v786_v15 = vld [vmem:[%s1145_s4 + $0x28] sm:$0xff]  ;;  %v785_v16 = vld [vmem:[%s1145_s4 + $0x20] sm:$0xff]  ;;  %v784_v25 = vld [vmem:[%s1145_s4 + $0x18] sm:$0xff] }
  0x15   :  { %211 = vmatpush.bf16.msra.mxu1 %v779_v5  ;;  %v815_v18 = vld [vmem:[#allocation2] ss:$0 sm:$0xff]  ;;  %v783_v26 = vld [vmem:[%s1145_s4 + $0x10] sm:$0xff]  ;;  %v782_v27 = vld [vmem:[%s1145_s4 + $0x8] sm:$0xff] }
  0x16   :  { %v781_v28 = vld [vmem:[%s1145_s4] sm:$0xff]  ;;  %v790_v37 = vld [vmem:[%s1141_s0 + $0x18] sm:$0xff]  ;;  %v789_v38 = vld [vmem:[%s1141_s0 + $0x10] sm:$0xff] }
  0x17   :  { %596 = vmatmul.msk.bf16.vlgmr.msra.gmra.mxu0 %vm138_vm0, %v122_v6  ;;  %v816_v30 = vld [vmem:[#allocation5] ss:$0 sm:$0xff]  ;;  %364 = vmatpush.bf16.msra.mxu3 %v790_v37  ;;  %v798_v39 = vld [vmem:[%s1143_s2 + $0x78] sm:$0xff]  ;;  %v797_v40 = vld [vmem:[%s1143_s2 + $0x70] sm:$0xff] }
  0x18   :  { %279 = vmatpush.bf16.msra.mxu2 %v787_v14  ;;  %426 = vmatpush.bf16.msrb.mxu0 %v798_v39  ;;  %v796_v41 = vld [vmem:[%s1143_s2 + $0x68] sm:$0xff]  ;;  %v795_v42 = vld [vmem:[%s1143_s2 + $0x60] sm:$0xff]  ;;  %v794_v51 = vld [vmem:[%s1143_s2 + $0x58] sm:$0xff] }
  0x19   :  { %212 = vmatpush.bf16.msra.mxu1 %v778_v7  ;;  %v817_v44 = vld [vmem:[%s1146_s5] ss:$0 sm:$0xff]  ;;  %v793_v52 = vld [vmem:[%s1143_s2 + $0x50] sm:$0xff]  ;;  %v792_v53 = vld [vmem:[%s1143_s2 + $0x48] sm:$0xff] }
  0x1a   :  { %v791_v54 = vld [vmem:[%s1143_s2 + $0x40] sm:$0xff]  ;;  %v806_v55 = vld [vmem:[%s1145_s4 + $0x78] sm:$0xff]  ;;  %v805_v56 = vld [vmem:[%s1145_s4 + $0x70] sm:$0xff] }
  0x1b   :  { %365 = vmatpush.bf16.msra.mxu3 %v789_v38  ;;  %v804_v57 = vld [vmem:[%s1145_s4 + $0x68] sm:$0xff]  ;;  %v803_v58 = vld [vmem:[%s1145_s4 + $0x60] sm:$0xff] }
  0x1c   :  { %280 = vmatpush.bf16.msra.mxu2 %v786_v15  ;;  %427 = vmatpush.bf16.msrb.mxu0 %v797_v40  ;;  %v818_v60 = vld [vmem:[#allocation2 + $0x1] ss:$0 sm:$0xff]  ;;  %v800_v5 = vld [vmem:[%s1145_s4 + $0x48] sm:$0xff] }
  0x1d   :  { %213 = vmatpush.bf16.msra.mxu1 %v777_v8  ;;  %v799_v6 = vld [vmem:[%s1145_s4 + $0x40] sm:$0xff] }
  0x1e   :  { %v819_v8 = vld [vmem:[#allocation5 + $0x1] ss:$0 sm:$0xff]  ;;  %v820_v15 = vld [vmem:[%s1146_s5 + $0x1] ss:$0 sm:$0xff] }
  0x1f   :  { %494 = vmatpush.bf16.msrb.mxu3 %v806_v55 }
  0x20   :  { %281 = vmatpush.bf16.msra.mxu2 %v785_v16  ;;  %428 = vmatpush.bf16.msrb.mxu0 %v796_v41 }
  0x21   :  { %214 = vmatpush.bf16.msra.mxu1 %v776_v9 }
  0x23   :  { %495 = vmatpush.bf16.msrb.mxu3 %v805_v56 }
  0x24   :  { %282 = vmatpush.bf16.msra.mxu2 %v784_v25  ;;  %429 = vmatpush.bf16.msrb.mxu0 %v795_v42 }
  0x25   :  { %215 = vmatpush.bf16.msra.mxu1 %v775_v10 }
  0x27   :  { %496 = vmatpush.bf16.msrb.mxu3 %v804_v57 }
  0x28   :  { %283 = vmatpush.bf16.msra.mxu2 %v783_v26  ;;  %430 = vmatpush.bf16.msrb.mxu0 %v794_v51 }
  0x29   :  { %216 = vmatpush.bf16.msra.mxu1 %v774_v11 }
  0x2b   :  { %497 = vmatpush.bf16.msrb.mxu3 %v803_v58 }
  0x2c   :  { %284 = vmatpush.bf16.msra.mxu2 %v782_v27  ;;  %431 = vmatpush.bf16.msrb.mxu0 %v793_v52  ;;  %v822_v52 = vld [vmem:[%s1148_s7] ss:$0 sm:$0xff] }
  0x2d   :  { %217 = vmatpush.bf16.msra.mxu1 %v773_v12 }
  0x30   :  { %285 = vmatpush.bf16.msra.mxu2 %v781_v28  ;;  %432 = vmatpush.bf16.msrb.mxu0 %v792_v53 }
  0x34   :  { %433 = vmatpush.bf16.msrb.mxu0 %v791_v54 }
  0x94   :  { %v151_v17 = vpop.f32.mrf.mxu0 }
  0x95   :  { %v152_v19 = vadd.f32 %v815_v18, %v151_v17 }
  0x97   :  { %v156_v22 = vmax.f32 %v152_v19, 0.0 }
  0x9c   :  { %v153_v20 = vpop.f32.mrf.mxu0 }
  0x9d   :  { %v154_v21 = vadd.f32 %v815_v18, %v153_v20 }
  0x9f   :  { %v157_v23 = vmax.f32 %v154_v21, 0.0 }
  0xa1   :  { %v158_v24 = vpack.c.bf16 %v157_v23, %v156_v22 }
  0xa3   :  { %218 = vmatmul.bf16.vlgmr.msra.gmra.mxu1 %v158_v24 }
 0x120   :  { %v219_v29 = vpop.f32.mrf.mxu1 }
 0x121   :  { %v220_v31 = vadd.f32 %v816_v30, %v219_v29 }
 0x123   :  { %v224_v34 = vmax.f32 %v220_v31, 0.0 }
 0x128   :  { %v221_v32 = vpop.f32.mrf.mxu1 }
 0x129   :  { %v222_v33 = vadd.f32 %v816_v30, %v221_v32 }
 0x12b   :  { %v225_v35 = vmax.f32 %v222_v33, 0.0 }
 0x12d   :  { %v226_v36 = vpack.c.bf16 %v225_v35, %v224_v34 }
 0x12f   :  { %286 = vmatmul.bf16.vlgmr.msra.gmra.mxu2 %v226_v36 }
 0x1b2   :  { %v287_v43 = vpop.f32.mrf.mxu2 }
 0x1b3   :  { %v288_v45 = vadd.f32 %v817_v44, %v287_v43 }
 0x1b5   :  { %v292_v48 = vadd.f32 %v288_v45, %v1008_v3  ;;  %v802_v3 = vld [vmem:[%s1145_s4 + $0x58] sm:$0xff] }
 0x1b6   :  { %498 = vmatpush.bf16.msrb.mxu3 %v802_v3 }
 0x1ba   :  { %v289_v46 = vpop.f32.mrf.mxu2 }
 0x1bb   :  { %v290_v47 = vadd.f32 %v817_v44, %v289_v46 }
 0x1bd   :  { %v293_v49 = vadd.f32 %v290_v47, %v1010_v4  ;;  %v801_v4 = vld [vmem:[%s1145_s4 + $0x50] sm:$0xff] }
 0x1be   :  { %499 = vmatpush.bf16.msrb.mxu3 %v801_v4 }
 0x1bf   :  { %v339_v50 = vpack.c.bf16 %v293_v49, %v292_v48 }
 0x1c1   :  { %706 = vmatmul.msk.bf16.vlgmr.msra.gmra.mxu3 %vm138_vm0, %v339_v50 }
 0x1c2   :  { %500 = vmatpush.bf16.msrb.mxu3 %v800_v5 }
 0x1c6   :  { %501 = vmatpush.bf16.msrb.mxu3 %v799_v6 }
 0x244   :  { %v367_v59 = vpop.f32.mrf.mxu3 }
 0x245   :  { %v368_v61 = vadd.f32 %v818_v60, %v367_v59 }
 0x247   :  { %v372_v0 = vmax.f32 %v368_v61, 0.0 }
 0x24c   :  { %v369_v62 = vpop.f32.mrf.mxu3 }
 0x24d   :  { %v370_v63 = vadd.f32 %v818_v60, %v369_v62 }
 0x24f   :  { %v373_v1 = vmax.f32 %v370_v63, 0.0 }
 0x251   :  { %v374_v2 = vpack.c.bf16 %v373_v1, %v372_v0 }
 0x253   :  { %434 = vmatmul.bf16.vlgmr.msrb.gmra.mxu0 %v374_v2 }
 0x2d0   :  { %v435_v7 = vpop.f32.mrf.mxu0 }
 0x2d1   :  { %v436_v9 = vadd.f32 %v819_v8, %v435_v7 }
 0x2d3   :  { %v440_v12 = vmax.f32 %v436_v9, 0.0 }
 0x2d8   :  { %v437_v10 = vpop.f32.mrf.mxu0 }
 0x2d9   :  { %v438_v11 = vadd.f32 %v819_v8, %v437_v10 }
 0x2db   :  { %v441_v13 = vmax.f32 %v438_v11, 0.0 }
 0x2dd   :  { %v442_v14 = vpack.c.bf16 %v441_v13, %v440_v12 }
 0x2df   :  { %502 = vmatmul.bf16.vlgmr.msrb.gmra.mxu3 %v442_v14 }
 0x362   :  { %v503_v16 = vpop.f32.mrf.mxu3 }
 0x363   :  { %v504_v17 = vadd.f32 %v820_v15, %v503_v16 }
 0x365   :  { %v508_v18 = vadd.f32 %v504_v17, %v292_v48  ;;  %v821_v48 = vld [vmem:[%s1147_s6] ss:$0 sm:$0xff]  ;;  %s936_s6 = smov [#allocation8]  }
 0x366   :  { %s572_s13 = sshll.u32 %s936_s6, 4  ;;  %s573_s13 = int_to_ptr.vmem [resolvable:$true] %s572_s13 }
 0x367   :  { %v510_v19 = vsel %vm138_vm0, %v508_v18, 0.0 }
 0x368   :  { %511 = vadd.xlane.f32.xlu0 %v510_v19 }
 0x36a   :  { %v505_v20 = vpop.f32.mrf.mxu3 }
 0x36b   :  { %v506_v21 = vadd.f32 %v820_v15, %v505_v20 }
 0x36d   :  { %v509_v22 = vadd.f32 %v506_v21, %v293_v49 }
 0x36f   :  { %v513_v23 = vsel %vm138_vm0, %v509_v22, 0.0 }
 0x370   :  { %514 = vadd.xlane.f32.xlu0 %v513_v23 }
 0x3db   :  { %v512_v24 = vpop.xlane.xlu0 %511 }
 0x3dc   :  { %v516_v25 = vmul.f32 0.03125, %v512_v24 }
 0x3de   :  { %v518_v26 = vsub.f32 %v508_v18, %v516_v25 }
 0x3e0   :  { %v520_v27 = vmul.f32 %v518_v26, %v518_v26 }
 0x3e2   :  { %v522_v28 = vsel %vm138_vm0, %v520_v27, 0.0 }
 0x3e3   :  { %523 = vadd.xlane.f32.xlu1 %v522_v28  ;;  %v515_v29 = vpop.xlane.xlu0 %514 }
 0x3e4   :  { %v517_v30 = vmul.f32 0.03125, %v515_v29 }
 0x3e6   :  { %v519_v31 = vsub.f32 %v509_v22, %v517_v30 }
 0x3e8   :  { %v521_v32 = vmul.f32 %v519_v31, %v519_v31 }
 0x3ea   :  { %v525_v33 = vsel %vm138_vm0, %v521_v32, 0.0 }
 0x3eb   :  { %526 = vadd.xlane.f32.xlu1 %v525_v33 }
 0x456   :  { %v524_v34 = vpop.xlane.xlu1 %523 }
 0x457   :  { %v528_v35 = vmul.f32 0.03125, %v524_v34 }
 0x459   :  { %v530_v36 = vadd.f32 1e-05, %v528_v35 }
 0x45b   :  { %823 = vrsqrt.f32 %v530_v36  ;;  %vm538_vm2 = vweird.f32 %v530_v36 }
 0x45e   :  { %v527_v37 = vpop.xlane.xlu1 %526 }
 0x45f   :  { %v529_v38 = vmul.f32 0.03125, %v527_v37 }
 0x461   :  { %v824_v39 = vpop.eup %823  ;;  %v531_v40 = vadd.f32 1e-05, %v529_v38 }
 0x462   :  { %v533_v41 = vmul.f32 %v824_v39, %v530_v36  ;;  %vm539_vm1 = vweird.f32 %v824_v39 }
 0x463   :  { %825 = vrsqrt.f32 %v531_v40  ;;  %vm540_vm3 = vmor %vm538_vm2, %vm539_vm1  ;;  %vm548_vm5 = vweird.f32 %v531_v40 }
 0x464   :  { %v534_v42 = vmul.f32 %v824_v39, %v533_v41 }
 0x466   :  { %v535_v43 = vmul.f32 0.5, %v534_v42 }
 0x468   :  { %v536_v44 = vsub.f32 1.5, %v535_v43 }
 0x469   :  { %v826_v45 = vpop.eup %825 }
 0x46a   :  { %v537_v46 = vmul.f32 %v824_v39, %v536_v44  ;;  %v543_v47 = vmul.f32 %v826_v45, %v531_v40  ;;  %vm549_vm4 = vweird.f32 %v826_v45 }
 0x46b   :  { %vm550_vm6 = vmor %vm548_vm5, %vm549_vm4 }
 0x46c   :  { %v541_v49 = vsel %vm540_vm3, %v824_v39, %v537_v46  ;;  %v544_v50 = vmul.f32 %v826_v45, %v543_v47 }
 0x46d   :  { %v552_v51 = vmul.f32 %v541_v49, %v518_v26 }
 0x46e   :  { %v545_v53 = vmul.f32 0.5, %v544_v50 }
 0x46f   :  { %v558_v54 = vmul.f32 %v821_v48, %v552_v51 }
 0x470   :  { %v546_v55 = vsub.f32 1.5, %v545_v53 }
 0x471   :  { %v564_v56 = vadd.f32 %v822_v52, %v558_v54 }
 0x472   :  { %v547_v57 = vmul.f32 %v826_v45, %v546_v55 }
 0x473   :  { %566 = vst.msk [vmem:[#allocation8] sm:$0xff] %vm138_vm0, %v564_v56 }
 0x474   :  { %v551_v58 = vsel %vm550_vm6, %v826_v45, %v547_v57 }
 0x475   :  { %v553_v59 = vmul.f32 %v551_v58, %v519_v31 }
 0x477   :  { %v559_v60 = vmul.f32 %v821_v48, %v553_v59 }
 0x479   :  { %v565_v61 = vadd.f32 %v822_v52, %v559_v60 }
 0x47b   :  { %567 = vst.msk [vmem:[#allocation8 + $0x8] sm:$0xff] %vm138_vm0, %v565_v61 }
 0x47c   :  { %580 = dma.vmem_to_hbm [thread:$0]  %s573_s13, 256, %s575_s16, [#allocation4], %s934_s25, %s934_s25, %s935_s26  }
 0x47d   :  { %927 = dma.done.wait [#allocation4], 256  }
 0x47e   :  { %928 = vsyncadd [#allocation4], 4294967040 }
 0x47f   :  { %585 = vsyncpa [#allocation3], 1 }
 0x480   :  { %586 = vsyncpa [#allocation6], 1 }
 0x481   :  { %587 = vsyncpa [#allocation4], 1 }

</bundles_post_ra>
